<compile_context>
chip_gen: v6e
topology: v6e:2x2x1
jax: 0.10.0
libtpu: 0.0.40
codegen_flags: <defaults>
</compile_context>

<pallas_src>
import math
import functools

import jax
import jax.numpy as jnp
from jax.experimental import pallas as pl
from jax.experimental.pallas import tpu as pltpu


_TARGET_BLOCK_BYTES = 2 * 1024 * 1024      # ~2 MiB per input block (double-buffered)
_VMEM_LIMIT_BYTES = 32 * 1024 * 1024       # explicit scoped-VMEM budget (safe on v5e/v6e/v7x)


# ----------------------------------------------------------------------------
# Pallas kernel (shared by both paths): out = emb * scale + pe  (pe broadcast on rows)
# ----------------------------------------------------------------------------

def _scale_add_kernel(emb_ref, pe_ref, o_ref, *, scale):
    # emb_ref: [rows, lanes]; pe_ref: [1, lanes] (broadcast over rows)
    o_ref[...] = (emb_ref[...] * scale + pe_ref[...]).astype(o_ref.dtype)


# ----------------------------------------------------------------------------
# Tile-size helpers (byte-budgeted, (8,128)-friendly)
# ----------------------------------------------------------------------------

def _pick_lane_tile(L, rows, itemsize, target_bytes=_TARGET_BLOCK_BYTES):
    """Largest multiple-of-128 divisor of L with rows*tl*itemsize ~<= target_bytes."""
    assert L % 128 == 0
    max_lanes = max(128, (target_bytes // max(rows * itemsize, 1)) // 128 * 128)
    tl = 128
    for t in range(min(L, max_lanes) // 128 * 128, 127, -128):
        if L % t == 0:
            tl = t
            break
    # v7x has 2 TensorCores sharing HBM: prefer >=2 grid steps on the parallel axis.
    if tl == L and L % 256 == 0:
        tl = L // 2
    return tl


def _pick_row_tile(R, lanes, itemsize, target_bytes=_TARGET_BLOCK_BYTES):
    """Row tile for the decode path: whole batch in one block unless it is huge."""
    if R * lanes * itemsize <= target_bytes or R % 8 != 0:
        return R
    max_rows = max(8, (target_bytes // max(lanes * itemsize, 1)) // 8 * 8)
    for r in range(min(R, max_rows) // 8 * 8, 7, -8):
        if R % r == 0:
            return r
    return R


# ----------------------------------------------------------------------------
# Host-side wrappers
# ----------------------------------------------------------------------------

def _pe_add_seq(emb, pe_flat, scale):
    """emb: (B, S, D); pe_flat: (1, max_len*D). Returns emb*scale + pe[:S] (broadcast on B)."""
    B, S, D = emb.shape
    L = S * D
    x = emb.reshape(B, L)                                   # lane-dense view
    if L % 128 == 0:
        pe_in = pe_flat                                     # index the full table by block
        Lp = L
    else:
        # Rare ragged fallback: pad the flattened lane axis to a multiple of 128 so the
        # blocks stay bounded/pipelined and stores stay unmasked (one pad + one slice).
        Lp = ((L + 127) // 128) * 128
        x = jnp.pad(x, ((0, 0), (0, Lp - L)))
        pe_in = jnp.pad(pe_flat[:, :L], ((0, 0), (0, Lp - L)))

    tl = _pick_lane_tile(Lp, B, x.dtype.itemsize)
    grid = (Lp // tl,)

    out = pl.pallas_call(
        functools.partial(_scale_add_kernel, scale=scale),
        out_shape=jax.ShapeDtypeStruct((B, Lp), emb.dtype),
        grid=grid,
        in_specs=[
            pl.BlockSpec((B, tl), lambda li: (0, li)),      # whole batch folded in: PE reused
            pl.BlockSpec((1, tl), lambda li: (0, li)),      # PE tile read once per seq tile
        ],
        out_specs=pl.BlockSpec((B, tl), lambda li: (0, li)),
        input_output_aliases={0: 0},                        # output may reuse emb's HBM buffer
        compiler_params=pltpu.CompilerParams(
            dimension_semantics=("parallel",),
            vmem_limit_bytes=_VMEM_LIMIT_BYTES),
    )(x, pe_in)

    if Lp != L:
        out = out[:, :L]
    return out.reshape(B, S, D)


def _pe_add_step(emb, pe_row, scale):
    """Decode path: emb*scale + pe[step] broadcast over batch & seq, one block / grid step."""
    B, S, D = emb.shape
    R = B * S
    x = emb.reshape(R, D)
    rt = _pick_row_tile(R, D, x.dtype.itemsize)
    grid = (R // rt,)                                       # typically (1,): whole batch in one block

    # TODO(synk): when D < 128 the decode-path stores are masked (lane underfill); the
    # data volume here is tiny so it is not worth the extra tiling of a lane-dense view.
    out = pl.pallas_call(
        functools.partial(_scale_add_kernel, scale=scale),
        out_shape=jax.ShapeDtypeStruct((R, D), emb.dtype),
        grid=grid,
        in_specs=[
            pl.BlockSpec((rt, D), lambda ri: (ri, 0)),
            pl.BlockSpec((1, D), lambda ri: (0, 0)),
        ],
        out_specs=pl.BlockSpec((rt, D), lambda ri: (ri, 0)),
        input_output_aliases={0: 0},
        compiler_params=pltpu.CompilerParams(
            dimension_semantics=("parallel",),
            vmem_limit_bytes=_VMEM_LIMIT_BYTES),
    )(x, pe_row)
    return out.reshape(B, S, D)


# ----------------------------------------------------------------------------
# Module wrapper
# ----------------------------------------------------------------------------

class PositionalEncodingPallas:
    def __init__(self, dropout, dim, max_len=5000, dtype=jnp.float32):
        assert dim % 2 == 0, "dim must be even (matches the torch pe buffer layout)"
        self.dim = dim
        self.max_len = max_len
        # TODO(synk): nn.Dropout is identity at inference; training-mode stochastic
        # dropout (RNG mask + 1/(1-p) scale) is not implemented here.
        self.dropout_p = dropout

        # Precomputed buffer, identical formula to the torch register_buffer.
        position = jnp.arange(max_len, dtype=jnp.float32)[:, None]            # [L, 1]
        div_term = jnp.exp(
            jnp.arange(0, dim, 2, dtype=jnp.float32) * (-math.log(10000.0) / dim)
        )                                                                      # [D/2]
        ang = position * div_term                                              # [L, D/2]
        pe = jnp.zeros((max_len, dim), jnp.float32)
        pe = pe.at[:, 0::2].set(jnp.sin(ang))
        pe = pe.at[:, 1::2].set(jnp.cos(ang))
        self.pe = pe.astype(dtype)                                             # [L, D]
        # Pre-flattened copy so the seq-path kernel can index lane-dense PE tiles
        # straight from HBM (no per-call slice/reshape of the table).
        self.pe_flat = self.pe.reshape(1, max_len * dim)                       # [1, L*D]

    def get_emb(self, emb):
        return self.pe[None, : emb.shape[1]]

    def __call__(self, emb, step=None):
        B, S, D = emb.shape
        assert D == self.dim
        scale = math.sqrt(self.dim)
        if step:  # mirror torch's `if step:` truthiness (step=0/None uses the seq path)
            step = int(step)                      # must be a concrete Python int (not a tracer)
            pe_row = self.pe[step][None, :]       # static 1-row slice, negligible
            return _pe_add_step(emb, pe_row, scale)
        return _pe_add_seq(emb, self.pe_flat, scale)


# ----------------------------------------------------------------------------
# Main
# ----------------------------------------------------------------------------

if __name__ == "__main__":
    batch, seq, dim = 2, 8, 32

    root = jax.random.PRNGKey(0)
    ka, kb = jax.random.split(root)
    emb_a = jax.random.normal(ka, (batch, seq, dim), jnp.float32)   # seq-path input
    emb_b = jax.random.normal(kb, (batch, seq, dim), jnp.float32)   # step-path input

    pe_mod = PositionalEncodingPallas(dropout=0.1, dim=dim, max_len=5000)
    scale = math.sqrt(dim)

    # References computed BEFORE the kernel calls (outputs may alias donated inputs).
    step = 3
    ref_seq = emb_a * scale + pe_mod.pe[None, :seq, :]
    ref_step = emb_b * scale + pe_mod.pe[step][None, None, :]
    ref_seq, ref_step = jax.block_until_ready((ref_seq, ref_step))

    # Default path: emb * sqrt(dim) + pe[:seq]
    out_seq = jax.block_until_ready(pe_mod(emb_a))
    # Step path (single decode position): emb * sqrt(dim) + pe[step]
    out_step = jax.block_until_ready(pe_mod(emb_b, step=step))

    assert out_seq.shape == (batch, seq, dim)
    assert out_step.shape == (batch, seq, dim)
    assert jnp.allclose(out_seq, ref_seq, atol=1e-5, rtol=1e-5), "seq-path mismatch vs reference"
    assert jnp.allclose(out_step, ref_step, atol=1e-5, rtol=1e-5), "step-path mismatch vs reference"

    print("KERNEL_OK")
</pallas_src>

<mosaic_0001>
module attributes {stable_mosaic.version = 11 : i64} {
  func.func @_scale_add_kernel(%arg0: i32, %arg1: memref<2x128xf32, #tpu.memory_space<vmem>>, %arg2: memref<1x128xf32, #tpu.memory_space<vmem>>, %arg3: memref<2x128xf32, #tpu.memory_space<vmem>>) attributes {dimension_semantics = [#tpu.dimension_semantics<parallel>], iteration_bounds = array<i64: 2>, scalar_prefetch = 0 : i64, scratch_operands = 0 : i64, tpu.core_type = #tpu.core_type<tc>, window_params = [{transform_indices = @transform_0, window_bounds = array<i64: 2, 128>}, {transform_indices = @transform_1, window_bounds = array<i64: 1, 128>}, {transform_indices = @transform_2, window_bounds = array<i64: 2, 128>}]} {
    %c0 = arith.constant 0 : index
    %c0_0 = arith.constant 0 : index
    %0 = vector.load %arg1[%c0, %c0_0] : memref<2x128xf32, #tpu.memory_space<vmem>>, vector<2x128xf32>
    %cst = arith.constant 5.65685415 : f32
    %1 = vector.broadcast %cst : f32 to vector<2x128xf32>
    %2 = arith.mulf %0, %1 : vector<2x128xf32>
    %c0_1 = arith.constant 0 : index
    %c0_2 = arith.constant 0 : index
    %3 = vector.load %arg2[%c0_1, %c0_2] : memref<1x128xf32, #tpu.memory_space<vmem>>, vector<1x128xf32>
    %4 = vector.broadcast %3 : vector<1x128xf32> to vector<2x128xf32>
    %5 = arith.addf %2, %4 : vector<2x128xf32>
    %c0_3 = arith.constant 0 : index
    %c0_4 = arith.constant 0 : index
    %6 = vector.load %arg3[%c0_3, %c0_4] : memref<2x128xf32, #tpu.memory_space<vmem>>, vector<2x128xf32>
    tpu.vector_store %arg3[%c0_3, %c0_4], %5 {strides = array<i32>} : memref<2x128xf32, #tpu.memory_space<vmem>>, vector<2x128xf32>,
    return
  }
  func.func @transform_0(%arg0: i32) -> (i32, i32) {
    %c0_i32 = arith.constant 0 : i32
    %c0_i32_0 = arith.constant 0 : i32
    return %c0_i32, %arg0 : i32, i32
  }
  func.func @transform_1(%arg0: i32) -> (i32, i32) {
    %c0_i32 = arith.constant 0 : i32
    %c0_i32_0 = arith.constant 0 : i32
    return %c0_i32, %arg0 : i32, i32
  }
  func.func @transform_2(%arg0: i32) -> (i32, i32) {
    %c0_i32 = arith.constant 0 : i32
    %c0_i32_0 = arith.constant 0 : i32
    return %c0_i32, %arg0 : i32, i32
  }
}

</mosaic_0001>

<bundles_post_ra>
// kernel: tpu_custom_call.1
= control target key start
LH: loop header
LB: loop body
LE: loop exit
PB: predicated region body
PF: predicated region fallthrough
CT: control target
= control target key end

     0   :  { %7 = vsyncpa [#allocation3], 0  ;;  %s706_s0 = inlined_call_operand.hbm [shape: f32[2,256], index: 0, kind: input, shape index: {}, may-alias: {0,2}]   ;;  %s707_s1 = inlined_call_operand.hbm [shape: f32[1,160000], index: 1, kind: input, shape index: {}]   ;;  %s708_s2 = inlined_call_operand.hbm [shape: f32[2,256], index: 2, kind: output, shape index: {}, may-alias: {0,2}]  }
   0x1   :  { %9 = vsyncpa [#allocation3 + $0x1], 0 }
   0x2   :  { %10 = vsyncpa [#allocation6], 0 }
   0x3   :  { %12 = vsyncpa [#allocation6 + $0x1], 0 }
   0x4   :  { %13 = vsyncpa [#allocation4], 0 }
   0x5   :  { %15 = vsyncpa [#allocation4 + $0x1], 0  ;;  %s517_s9 = smov 0   ;;  %s519_s10 = smov 0  }
   0x6   :  { %s521_s11 = smov 0   ;;  %s523_s12 = smov 0  }
   0x7 LB: > { %s538_s13 = sadd.s32 4294967295, %s497_s12   ;;  %s308_s14 = sadd.s32 4294967294, %s497_s12   ;;  %s497_s12 = sphi %s523_s12, %s727_s12   ;;  %s493_s11 = sphi %s521_s11, %s726_s11   ;;  %s489_s10 = sphi %s519_s10, %s725_s10   ;;  %s485_s9 = sphi %s517_s9, %s724_s9  }
   0x8   : > { %s542_s15 = sadd.s32 1, %s497_s12   ;;  %s28_s16 = sadd.s32 1, %s493_s11 }
   0x9   : > { %s25_s17 = ssub.s32 %s497_s12, %s542_s15  ;;  %p35_p0 = scmp.ne.s32.totalorder %s493_s11, %s489_s10 }
   0xa   : > { %p26_p1 = scmp.eq.s32.totalorder %s25_s17, 0  ;;  %p36_p2 = scmp.eq.s32.totalorder %s497_s12, 0 }
   0xb   : > { %p41_p3 = scmp.ne.s32.totalorder %s489_s10, %s485_s9  ;;  %p42_p4 = scmp.eq.s32.totalorder %s538_s13, 0 }
   0xc   : > { %s554_s18 = scalar_select %p26_p1, %s493_s11, %s28_s16  }
   0xd   : > { %p556_p5 = por %p36_p2, %p35_p0  ;;  %p560_p6 = por %p42_p4, %p41_p3 }
   0xe   : > { %p91_p7 = scmp.eq.s32.totalorder %s538_s13, 1  ;;  %p97_p8 = scmp.eq.s32.totalorder %s308_s14, 1 }
   0xf   : > { %s712_s20 = scalar_select %p560_p6, 1, 0 }
  0x10   : > { %p339_p10 = scmp.lt.s32.totalorder %s497_s12, 2  ;;  %p567_p11 = por %p91_p7, %p35_p0 }
  0x11   : > { %p571_p12 = por %p97_p8, %p41_p3  ;;  %s576_s23 = sand.u32 1, %s493_s11  }
  0x12   : > { %s713_s21 = scalar_select %p567_p11, 1, 0 }
  0x13   : > { %s714_s22 = scalar_select %p571_p12, 1, 0 }
  0x14   : > { %s312_s24 = sshll.u32 %s497_s12, 5  ;;  %s311_s25 = sshll.u32 %s576_s23, 1 }
  0x15   : > { %s583_s28 = scalar_lea.hbm %s706_s0, %s312_s24  ;;  %s121_s29 = scalar_lea.vmem [#allocation2], %s311_s25 }
  0x16   : > { %s128_s30 = sshll.u32 %s121_s29, 4  ;;  %p587_p13 = pnand %p339_p10, %p556_p5  ;;  %s591_s30 = int_to_ptr.vmem [resolvable:$true] %s128_s30 }
  0x17   : > { %s118_s4 = scalar_lea.sflag [#allocation3], %s576_s23  ;;  %s373_s5 = scalar_lea.hbm %s583_s28, 32 }
  0x18   : > { %p374_p2 = scmp.ne.s32.totalorder %s583_s28, %s373_s5  ;;  %p375_p3 = pneg %p587_p13 }
  0x19   : > { %s378_s8 = scalar_lea.hbm %s706_s0, 64  ;;  %p379_p5 = scmp.lt.s32.totalorder %s583_s28, %s706_s0 }
  0x1a   : > { %p376_p4 = pnand %p375_p3, %p374_p2  ;;  %p380_p8 = scmp.lt.s32.totalorder %s378_s8, %s373_s5 }
  0x1c   : > { %p377_p7 = pneg %p376_p4  ;;  %p381_p10 = por %p380_p8, %p379_p5 }
  0x1e   : > { %p382_p9 = pnand %p381_p10, %p377_p7 }
  0x20   : > { %385 = shalt.err (!%p382_p9)
}
  0x21   : > { %s386_s17 = scalar_lea.vmem %s591_s30, 32  ;;  %s499_s19 = smov [#allocation2]  }
  0x22   : > { %p387_p0 = scmp.ne.s32.totalorder %s591_s30, %s386_s17  ;;  %s391_s24 = sshll.u32 %s499_s19, 4  ;;  %s392_s24 = int_to_ptr.vmem [resolvable:$false] %s391_s24 }
  0x23   : > { %s393_s25 = scalar_lea.vmem %s392_s24, 64  ;;  %p394_p1 = scmp.lt.s32.totalorder %s591_s30, %s392_s24 }
  0x24   : > { %p389_p2 = pnand %p387_p0, %p375_p3  ;;  %p395_p12 = scmp.lt.s32.totalorder %s393_s25, %s386_s17 }
  0x26   : > { %p390_p4 = pneg %p389_p2  ;;  %p396_p11 = por %p395_p12, %p394_p1 }
  0x28   : > { %p397_p5 = pnand %p396_p11, %p390_p4 }
  0x2a   : > { %400 = shalt.err (!%p397_p5)
}
  0x2b   : > { %331 = dma.hbm_to_vmem [thread:$0]  (!%p587_p13), %s583_s28, 32, %s591_s30, %s118_s4  }
  0x2c   : > { %p716_p9 = scmp.lt.s32.totalorder %s497_s12, 3  ;;  %p717_p0 = scmp.ge.s32.totalorder %s497_s12, 1 }
  0x2d   : > { %s313_s27 = sshll.u32 %s497_s12, 4  ;;  %s138_s7 = scalar_lea.vmem [#allocation5], %s576_s23 }
  0x2e   : > { %p624_p7 = pnand %p717_p0, %p716_p9  ;;  %s632_s6 = scalar_lea.hbm %s707_s1, %s313_s27 }
  0x2f   : > { %s145_s8 = sshll.u32 %s138_s7, 4  ;;  %s136_s14 = scalar_lea.sflag [#allocation6], %s576_s23  ;;  %s146_s8 = int_to_ptr.vmem [resolvable:$true] %s145_s8 }
  0x30   : > { %s718_s26 = scalar_select %p624_p7, 1, 0 }
  0x31   : > { %s401_s28 = scalar_lea.hbm %s632_s6, 16  ;;  %s406_s16 = scalar_lea.hbm %s707_s1, 20000 }
  0x32   : > { %p402_p11 = scmp.ne.s32.totalorder %s632_s6, %s401_s28  ;;  %p407_p8 = scmp.lt.s32.totalorder %s632_s6, %s707_s1 }
  0x33   : > { %p408_p10 = scmp.lt.s32.totalorder %s406_s16, %s401_s28 }
  0x34   : > { %p404_p12 = pnand %p402_p11, %p375_p3 }
  0x35   : > { %p409_p2 = por %p408_p10, %p407_p8 }
  0x36   : > { %p405_p1 = pneg %p404_p12 }
  0x38   : > { %p410_p4 = pnand %p409_p2, %p405_p1 }
  0x3a   : > { %413 = shalt.err (!%p410_p4)
}
  0x3b   : > { %s414_s24 = scalar_lea.vmem %s146_s8, 16  ;;  %s500_s23 = smov [#allocation5]  }
  0x3c   : > { %p415_p5 = scmp.ne.s32.totalorder %s146_s8, %s414_s24  ;;  %s419_s25 = sshll.u32 %s500_s23, 4  ;;  %s420_s25 = int_to_ptr.vmem [resolvable:$false] %s419_s25 }
  0x3d   : > { %s421_s27 = scalar_lea.vmem %s420_s25, 32  ;;  %p422_p11 = scmp.lt.s32.totalorder %s146_s8, %s420_s25 }
  0x3e   : > { %p417_p9 = pnand %p415_p5, %p375_p3  ;;  %p423_p12 = scmp.lt.s32.totalorder %s421_s27, %s414_s24 }
  0x40   : > { %p418_p0 = pneg %p417_p9  ;;  %p424_p6 = por %p423_p12, %p422_p11 }
  0x42   : > { %p425_p7 = pnand %p424_p6, %p418_p0 }
  0x44   : > { %428 = shalt.err (!%p425_p7)
}
  0x45   : > { %334 = dma.hbm_to_vmem [thread:$0]  (!%p587_p13), %s632_s6, 16, %s146_s8, %s136_s14  }
  0x46   : > { %p719_p1 = scmp.ne.s32.totalorder %s718_s26, 0 }
  0x47   : > { %s657_s29 = sand.u32 (!%p719_p1), 1, %s489_s10   ;;  %p720_p3 = scmp.ne.s32.totalorder (!%p719_p1), %s712_s20, 0 }
  0x48   : > { %154 = sbr.rel (%p719_p1) target bundleno = 105 (0x69), region = 28  ;;  %s315_s5 = sshll.u32 (!%p719_p1), %s657_s29, 1 }
  0x49   : > { %s157_s7 = scalar_lea.sflag (!%p719_p1), [#allocation3], %s657_s29  ;;  %s160_s28 = scalar_lea.vmem (!%p719_p1), [#allocation2], %s315_s5 }
  0x4d   : > { %472 = dma.done.wait (%p720_p3), %s157_s7, 32  }
  0x4e   : > { %474 = vsyncadd (%p720_p3), %s157_s7, 4294967264  ;;  %s166_s3 = scalar_lea.sflag [#allocation6], %s657_s29  ;;  %s168_s26 = scalar_lea.vmem [#allocation5], %s657_s29 }
  0x4f   : > { %476 = dma.done.wait (%p720_p3), %s166_s3, 16  }
  0x50   : > { %478 = vsyncadd (%p720_p3), %s166_s3, 4294967280  ;;  %v193_v0 = vld [vmem:[%s160_s28] sm:$0x3]  ;;  %s192_s6 = scalar_lea.vmem [#allocation7], %s315_s5  ;;  %s319_s14 = sshll.u32 %s538_s13, 5 }
  0x51   : > { %v317_v1 = vld [vmem:[%s168_s26] ss:$0 sm:$0xff]  ;;  %s218_s8 = sshll.u32 %s192_s6, 4  ;;  %v194_v2 = vmul.f32 5.656854, %v193_v0  ;;  %s216_s16 = scalar_lea.hbm %s708_s2, %s319_s14  ;;  %s219_s8 = int_to_ptr.vmem [resolvable:$true] %s218_s8 }
  0x52   : > { %s205_s17 = scalar_lea.sflag [#allocation4], %s657_s29  ;;  %s429_s19 = scalar_lea.vmem %s219_s8, 32 }
  0x53   : > { %v202_v3 = vadd.f32 %v317_v1, %v194_v2  ;;  %p430_p6 = scmp.ne.s32.totalorder %s219_s8, %s429_s19  ;;  %p721_p13 = scmp.ne.s32.totalorder %s713_s21, 0 }
  0x54   : > { %s501_s20 = smov [#allocation7]  }
  0x55   : > { %203 = vst [vmem:[%s192_s6] sm:$0x3] %v202_v3  ;;  %p431_p7 = pnand %p430_p6, %p721_p13  ;;  %s433_s24 = sshll.u32 %s501_s20, 4  ;;  %s434_s24 = int_to_ptr.vmem [resolvable:$false] %s433_s24 }
  0x56   : > { %s435_s23 = scalar_lea.vmem %s434_s24, 64  ;;  %p436_p10 = scmp.lt.s32.totalorder %s219_s8, %s434_s24 }
  0x57   : > { %p432_p8 = pneg %p431_p7  ;;  %p437_p2 = scmp.lt.s32.totalorder %s435_s23, %s429_s19 }
  0x59   : > { %p438_p4 = por %p437_p2, %p436_p10 }
  0x5b   : > { %p439_p5 = pnand %p438_p4, %p432_p8 }
  0x5d   : > { %442 = shalt.err (!%p439_p5)
}
  0x5e   : > { %s443_s13 = scalar_lea.hbm %s216_s16, 32  ;;  %s447_s29 = scalar_lea.hbm %s708_s2, 64 }
  0x5f   : > { %p444_p9 = scmp.ne.s32.totalorder %s216_s16, %s443_s13  ;;  %p448_p12 = scmp.lt.s32.totalorder %s216_s16, %s708_s2 }
  0x60   : > { %p449_p1 = scmp.lt.s32.totalorder %s447_s29, %s443_s13 }
  0x61   : > { %p445_p0 = pnand %p444_p9, %p721_p13 }
  0x62   : > { %p450_p3 = por %p449_p1, %p448_p12 }
  0x63   : > { %p446_p11 = pneg %p445_p0 }
  0x65   : > { %p451_p6 = pnand %p450_p3, %p446_p11 }
  0x67   : > { %454 = shalt.err (!%p451_p6)
}
  0x68   : > { %326 = dma.vmem_to_hbm [thread:$0]  (%p721_p13), %s219_s8, 32, %s216_s16, %s205_s17  }
  0x69 PF: > { %s230_s28 = sand.u32 1, %s485_s9   ;;  %p722_p7 = scmp.ne.s32.totalorder %s714_s22, 0 }
  0x6a   : > { %p723_p8 = scmp.ge.s32.totalorder %s497_s12, 2  ;;  %s231_s3 = scalar_lea.sflag [#allocation4], %s230_s28 }
  0x6c   : > { %p336_p10 = pnand %p723_p8, %p722_p7 }
  0x6e   : > { %p337_p2 = pneg %p336_p10 }
  0x70   : > { %480 = dma.done.wait (%p337_p2), %s231_s3, 32  }
  0x71   : > { %482 = vsyncadd (%p337_p2), %s231_s3, 4294967264  ;;  %p18_p4 = scmp.ge.s32.totalorder %s542_s15, 4   ;;  %s724_s9 = smov %s489_s10 }
  0x72   : > { %s725_s10 = smov %s493_s11  ;;  %s726_s11 = smov %s554_s18 }
  0x73   : > { %s727_s12 = smov %s542_s15  ;;  %20 = sbr.rel (!%p18_p4) target bundleno = 7 (0x7), region = 86 }
  0x78   :  { %236 = vsyncpa [#allocation3], 1 }
  0x79   :  { %238 = vsyncpa [#allocation3 + $0x1], 1 }
  0x7a   :  { %239 = vsyncpa [#allocation6], 1 }
  0x7b   :  { %241 = vsyncpa [#allocation6 + $0x1], 1 }
  0x7c   :  { %242 = vsyncpa [#allocation4], 1 }
  0x7d   :  { %244 = vsyncpa [#allocation4 + $0x1], 1 }

</bundles_post_ra>
